<compile_context>
chip_gen: v7x
topology: tpu7x:2x2x1
jax: 0.10.0
libtpu: 0.0.40
codegen_flags: <defaults>
</compile_context>

<pallas_src>
import jax
import jax.numpy as jnp
from jax.experimental import pallas as pl
from jax.experimental.pallas import tpu as pltpu


def _round_up(n, m):
    return ((n + m - 1) // m) * m


# ---------------------------------------------------------------------------
# Kernel bodies
# ---------------------------------------------------------------------------
def _mlp_body(x_ref, w1_ref, b1_ref, w2_ref, b2_ref, w3_ref, b3_ref):
    """Shared forward math; returns (logits_f32, feats_f32), lane-padded."""
    x = x_ref[...]
    h1 = jnp.dot(x, w1_ref[...], preferred_element_type=jnp.float32) + b1_ref[...]
    h1 = jnp.maximum(h1, 0.0)                 # ReLU; Dropout == identity (eval)
    h2 = jnp.dot(h1.astype(w2_ref.dtype), w2_ref[...],
                 preferred_element_type=jnp.float32) + b2_ref[...]
    h2 = jnp.maximum(h2, 0.0)
    logits = jnp.dot(h2.astype(w3_ref.dtype), w3_ref[...],
                     preferred_element_type=jnp.float32) + b3_ref[...]
    return logits, h2


def _kernel_logits(x_ref, w1_ref, b1_ref, w2_ref, b2_ref, w3_ref, b3_ref,
                   out_ref):
    logits, _ = _mlp_body(x_ref, w1_ref, b1_ref, w2_ref, b2_ref, w3_ref, b3_ref)
    # Only the real OUT columns are written (out_ref width == OUT); avoids the
    # 32x padded write traffic when OUT is tiny (e.g. 4).
    out_ref[...] = logits[:, :out_ref.shape[1]].astype(out_ref.dtype)


def _kernel_logits_and_feats(x_ref, w1_ref, b1_ref, w2_ref, b2_ref, w3_ref,
                             b3_ref, out_ref):
    logits, feats = _mlp_body(x_ref, w1_ref, b1_ref, w2_ref, b2_ref, w3_ref,
                              b3_ref)
    out_w = logits.shape[1]                   # static, multiple of 128
    out_ref[:, :out_w] = logits.astype(out_ref.dtype)
    out_ref[:, out_w:] = feats.astype(out_ref.dtype)


# ---------------------------------------------------------------------------
# Parameter preparation (one-time; do this at model-load time, not per call)
# ---------------------------------------------------------------------------
def prepare_params(params, compute_dtype=jnp.float32):
    """Zero-pad weight/bias lane dims to multiples of 128 and cast weights to
    `compute_dtype` (bf16 recommended on v5e/v6e/v7x).  Zero padding keeps the
    math exact: padded hidden columns stay 0 through ReLU and contribute 0."""
    w1, b1 = params["w1"], params["b1"]
    w2, b2 = params["w2"], params["b2"]
    w3, b3 = params["w3"], params["b3"]

    D, H1 = w1.shape
    H2 = w2.shape[1]
    OUT = w3.shape[1]
    # Only pad D when it is already large; for tiny D the extra x DMA bytes
    # would outweigh the benefit of unmasked K tiles.
    Dp = _round_up(D, 128) if D > 128 else D
    H1p, H2p, OUTp = (_round_up(d, 128) for d in (H1, H2, OUT))

    w1p = jnp.zeros((Dp, H1p), compute_dtype).at[:D, :H1].set(w1.astype(compute_dtype))
    b1p = jnp.zeros((1, H1p), jnp.float32).at[:, :H1].set(b1.astype(jnp.float32))
    w2p = jnp.zeros((H1p, H2p), compute_dtype).at[:H1, :H2].set(w2.astype(compute_dtype))
    b2p = jnp.zeros((1, H2p), jnp.float32).at[:, :H2].set(b2.astype(jnp.float32))
    w3p = jnp.zeros((H2p, OUTp), compute_dtype).at[:H2, :OUT].set(w3.astype(compute_dtype))
    b3p = jnp.zeros((1, OUTp), jnp.float32).at[:, :OUT].set(b3.astype(jnp.float32))

    return {
        "w1": w1p, "b1": b1p,
        "w2": w2p, "b2": b2p,
        "w3": w3p, "b3": b3p,
        "dims": (D, H1, H2, OUT),
    }


def _resident_spec(shape):
    """Weights/biases: constant block index -> block stays resident in VMEM
    across all grid steps.  Buffered(1): no double buffer for blocks whose
    index never changes (halves weight VMEM footprint)."""
    idx = lambda i: (0, 0)
    try:
        return pl.BlockSpec(shape, idx, pipeline_mode=pl.Buffered(1))
    except TypeError:  # older jax without pipeline_mode kwarg
        return pl.BlockSpec(shape, idx)


# ---------------------------------------------------------------------------
# Forward wrapper
# ---------------------------------------------------------------------------
def tabularnet_forward(x, prepared, return_feats=False, *, batch_tile=512):
    """x: (B, input_dim) unpadded.  prepared: output of prepare_params()."""
    w1p, b1p = prepared["w1"], prepared["b1"]
    w2p, b2p = prepared["w2"], prepared["b2"]
    w3p, b3p = prepared["w3"], prepared["b3"]
    D, H1, H2, OUT = prepared["dims"]
    Dp, H1p = w1p.shape
    H2p = w2p.shape[1]
    OUTp = w3p.shape[1]
    compute_dtype = w1p.dtype
    itemsize = jnp.dtype(compute_dtype).itemsize

    B = x.shape[0]
    assert x.shape[1] == D, "x feature dim does not match params"

    # ---- batch tile: multiple of 8, minimal tail padding, and >=2 grid steps
    #      whenever possible so ("parallel",) can shard across both v7x TCs.
    batch_tile = max(8, _round_up(batch_tile, 8))
    n_steps = max(1, pl.cdiv(B, batch_tile))
    if B > 8:
        n_steps = max(n_steps, 2)
    tb = max(8, min(batch_tile, _round_up(pl.cdiv(B, n_steps), 8)))

    out_w = (OUTp + H2p) if return_feats else OUT

    # ---- VMEM budget: weights single-buffered + 2x x tile + 2x out tile +
    #      live f32 intermediates.  Shrink tb if needed (v7x: 64 MiB/TC) and
    #      set an explicit scoped-VMEM limit (v5e default is only 16 MiB).
    resident_bytes = ((w1p.size + w2p.size + w3p.size) * itemsize
                      + (b1p.size + b2p.size + b3p.size) * 4)

    def _vmem_estimate(tile):
        return (resident_bytes
                + 2 * tile * Dp * itemsize              # x double-buffer
                + 2 * tile * out_w * 4                  # out double-buffer
                + 3 * tile * max(H1p, H2p, OUTp) * 4)   # f32 intermediates

    budget = 48 << 20
    while tb > 8 and _vmem_estimate(tb) > budget:
        tb = max(8, _round_up(tb // 2, 8))
    vmem_limit = int(min(max(_vmem_estimate(tb) * 5 // 4 + (2 << 20), 16 << 20),
                         56 << 20))

    B_pad = _round_up(B, tb)
    xp = x.astype(compute_dtype)
    if B_pad != B or Dp != D:
        xp = jnp.pad(xp, ((0, B_pad - B), (0, Dp - D)))
    grid = (B_pad // tb,)

    kernel = _kernel_logits_and_feats if return_feats else _kernel_logits

    flops = 2 * B_pad * (Dp * H1p + H1p * H2p + H2p * OUTp)
    bytes_accessed = int(B_pad * Dp * itemsize + resident_bytes
                         + B_pad * out_w * 4)

    out = pl.pallas_call(
        kernel,
        out_shape=jax.ShapeDtypeStruct((B_pad, out_w), jnp.float32),
        grid=grid,
        in_specs=[
            pl.BlockSpec((tb, Dp), lambda i: (i, 0)),   # x: tiled over batch
            _resident_spec((Dp, H1p)), _resident_spec((1, H1p)),
            _resident_spec((H1p, H2p)), _resident_spec((1, H2p)),
            _resident_spec((H2p, OUTp)), _resident_spec((1, OUTp)),
        ],
        out_specs=pl.BlockSpec((tb, out_w), lambda i: (i, 0)),
        compiler_params=pltpu.CompilerParams(
            dimension_semantics=("parallel",),
            vmem_limit_bytes=vmem_limit),
        cost_estimate=pl.CostEstimate(flops=flops, transcendentals=0,
                                      bytes_accessed=bytes_accessed),
    )(xp, w1p, b1p, w2p, b2p, w3p, b3p)

    if return_feats:
        logits = out[:B, :OUT]
        feats = out[:B, OUTp:OUTp + H2]
        return logits, feats
    return out[:B]


# ---------------------------------------------------------------------------
# Synthetic init + pure-JAX reference
# ---------------------------------------------------------------------------
def init_params(key, input_dim, layers, output_dim):
    """Deterministic synthetic init matching TabularNet('mlp', ...) shapes."""
    if layers is None or len(layers) == 0:
        layers = [input_dim // 2, input_dim // 4]
    h1, h2 = layers[0], layers[1]
    k1, k2, k3, k4, k5, k6 = jax.random.split(key, 6)
    scale = 0.1
    return {
        "w1": (scale * jax.random.normal(k1, (input_dim, h1))).astype(jnp.float32),
        "b1": (scale * jax.random.normal(k2, (1, h1))).astype(jnp.float32),
        "w2": (scale * jax.random.normal(k3, (h1, h2))).astype(jnp.float32),
        "b2": (scale * jax.random.normal(k4, (1, h2))).astype(jnp.float32),
        "w3": (scale * jax.random.normal(k5, (h2, output_dim))).astype(jnp.float32),
        "b3": (scale * jax.random.normal(k6, (1, output_dim))).astype(jnp.float32),
    }


def reference_forward(x, params):
    """Pure-JAX reference of the same forward pass (eval-mode dropout)."""
    h1 = jnp.maximum(x @ params["w1"] + params["b1"], 0.0)
    h2 = jnp.maximum(h1 @ params["w2"] + params["b2"], 0.0)
    out = h2 @ params["w3"] + params["b3"]
    return out, h2


if __name__ == "__main__":
    key = jax.random.PRNGKey(0)
    kx, kp = jax.random.split(key)

    batch = 20              # > 8 and not tile-aligned: exercises 2-step grid + tail padding
    input_dim = 32          # default layers would be [16, 8]
    layers = [16, 8]
    output_dim = 4

    x = jax.random.normal(kx, (batch, input_dim), dtype=jnp.float32)
    params = init_params(kp, input_dim, layers, output_dim)
    ref_out, ref_feats = reference_forward(x, params)

    # --- f32 path (exact vs reference) -----------------------------------
    prepared_f32 = prepare_params(params, compute_dtype=jnp.float32)
    out, feats = tabularnet_forward(x, prepared_f32, return_feats=True)
    out_only = tabularnet_forward(x, prepared_f32, return_feats=False)
    jax.block_until_ready((out, feats, out_only))

    assert out.shape == (batch, output_dim)
    assert feats.shape == (batch, layers[-1])
    assert out_only.shape == (batch, output_dim)
    assert jnp.allclose(out, ref_out, atol=1e-5, rtol=1e-5)
    assert jnp.allclose(feats, ref_feats, atol=1e-5, rtol=1e-5)
    assert jnp.allclose(out_only, ref_out, atol=1e-5, rtol=1e-5)

    # --- bf16 path (halved x/weight DMA bytes; f32 accumulation) ---------
    prepared_bf16 = prepare_params(params, compute_dtype=jnp.bfloat16)
    out_bf16 = tabularnet_forward(x, prepared_bf16, return_feats=False)
    jax.block_until_ready(out_bf16)
    assert out_bf16.shape == (batch, output_dim)
    assert jnp.allclose(out_bf16, ref_out, atol=5e-2, rtol=5e-2)

    print("KERNEL_OK")
</pallas_src>

<mosaic_0001>
module attributes {stable_mosaic.version = 11 : i64} {
  func.func @_kernel_logits_and_feats(%arg0: i32, %arg1: memref<16x32xf32, #tpu.memory_space<vmem>>, %arg2: memref<32x128xf32, #tpu.memory_space<vmem>>, %arg3: memref<1x128xf32, #tpu.memory_space<vmem>>, %arg4: memref<128x128xf32, #tpu.memory_space<vmem>>, %arg5: memref<1x128xf32, #tpu.memory_space<vmem>>, %arg6: memref<128x128xf32, #tpu.memory_space<vmem>>, %arg7: memref<1x128xf32, #tpu.memory_space<vmem>>, %arg8: memref<16x256xf32, #tpu.memory_space<vmem>>) attributes {dimension_semantics = [#tpu.dimension_semantics<parallel>], iteration_bounds = array<i64: 2>, scalar_prefetch = 0 : i64, scratch_operands = 0 : i64, tpu.core_type = #tpu.core_type<tc>, window_params = [{transform_indices = @transform_0, window_bounds = array<i64: 16, 32>}, {pipeline_mode = #tpu.pipeline_mode<synchronous>, transform_indices = @transform_1, window_bounds = array<i64: 32, 128>}, {pipeline_mode = #tpu.pipeline_mode<synchronous>, transform_indices = @transform_2, window_bounds = array<i64: 1, 128>}, {pipeline_mode = #tpu.pipeline_mode<synchronous>, transform_indices = @transform_3, window_bounds = array<i64: 128, 128>}, {pipeline_mode = #tpu.pipeline_mode<synchronous>, transform_indices = @transform_4, window_bounds = array<i64: 1, 128>}, {pipeline_mode = #tpu.pipeline_mode<synchronous>, transform_indices = @transform_5, window_bounds = array<i64: 128, 128>}, {pipeline_mode = #tpu.pipeline_mode<synchronous>, transform_indices = @transform_6, window_bounds = array<i64: 1, 128>}, {transform_indices = @transform_7, window_bounds = array<i64: 16, 256>}]} {
    %c0 = arith.constant 0 : index
    %c0_0 = arith.constant 0 : index
    %0 = vector.load %arg1[%c0, %c0_0] : memref<16x32xf32, #tpu.memory_space<vmem>>, vector<16x32xf32>
    %c0_1 = arith.constant 0 : index
    %c0_2 = arith.constant 0 : index
    %1 = vector.load %arg2[%c0_1, %c0_2] : memref<32x128xf32, #tpu.memory_space<vmem>>, vector<32x128xf32>
    %cst = arith.constant dense<0.000000e+00> : vector<16x128xf32>
    %2 = tpu.matmul %0, %1, %cst {dimension_numbers = #tpu.dot_dimension_numbers<[1], [0], [0], [1], [0, 0, 1, 1], [], []>} : vector<16x32xf32>, vector<32x128xf32>, vector<16x128xf32> -> vector<16x128xf32>
    %c0_3 = arith.constant 0 : index
    %c0_4 = arith.constant 0 : index
    %3 = vector.load %arg3[%c0_3, %c0_4] : memref<1x128xf32, #tpu.memory_space<vmem>>, vector<1x128xf32>
    %4 = vector.broadcast %3 : vector<1x128xf32> to vector<16x128xf32>
    %5 = arith.addf %2, %4 : vector<16x128xf32>
    %cst_5 = arith.constant 0.000000e+00 : f32
    %6 = vector.broadcast %cst_5 : f32 to vector<16x128xf32>
    %7 = arith.maximumf %5, %6 : vector<16x128xf32>
    %c0_6 = arith.constant 0 : index
    %c0_7 = arith.constant 0 : index
    %8 = vector.load %arg4[%c0_6, %c0_7] : memref<128x128xf32, #tpu.memory_space<vmem>>, vector<128x128xf32>
    %cst_8 = arith.constant dense<0.000000e+00> : vector<16x128xf32>
    %9 = tpu.matmul %7, %8, %cst_8 {dimension_numbers = #tpu.dot_dimension_numbers<[1], [0], [0], [1], [0, 0, 1, 1], [], []>} : vector<16x128xf32>, vector<128x128xf32>, vector<16x128xf32> -> vector<16x128xf32>
    %c0_9 = arith.constant 0 : index
    %c0_10 = arith.constant 0 : index
    %10 = vector.load %arg5[%c0_9, %c0_10] : memref<1x128xf32, #tpu.memory_space<vmem>>, vector<1x128xf32>
    %11 = vector.broadcast %10 : vector<1x128xf32> to vector<16x128xf32>
    %12 = arith.addf %9, %11 : vector<16x128xf32>
    %cst_11 = arith.constant 0.000000e+00 : f32
    %13 = vector.broadcast %cst_11 : f32 to vector<16x128xf32>
    %14 = arith.maximumf %12, %13 : vector<16x128xf32>
    %c0_12 = arith.constant 0 : index
    %c0_13 = arith.constant 0 : index
    %15 = vector.load %arg6[%c0_12, %c0_13] : memref<128x128xf32, #tpu.memory_space<vmem>>, vector<128x128xf32>
    %cst_14 = arith.constant dense<0.000000e+00> : vector<16x128xf32>
    %16 = tpu.matmul %14, %15, %cst_14 {dimension_numbers = #tpu.dot_dimension_numbers<[1], [0], [0], [1], [0, 0, 1, 1], [], []>} : vector<16x128xf32>, vector<128x128xf32>, vector<16x128xf32> -> vector<16x128xf32>
    %c0_15 = arith.constant 0 : index
    %c0_16 = arith.constant 0 : index
    %17 = vector.load %arg7[%c0_15, %c0_16] : memref<1x128xf32, #tpu.memory_space<vmem>>, vector<1x128xf32>
    %18 = vector.broadcast %17 : vector<1x128xf32> to vector<16x128xf32>
    %19 = arith.addf %16, %18 : vector<16x128xf32>
    %c0_17 = arith.constant 0 : index
    %c0_18 = arith.constant 0 : index
    %20 = vector.load %arg8[%c0_17, %c0_18] : memref<16x256xf32, #tpu.memory_space<vmem>>, vector<16x128xf32>
    tpu.vector_store %arg8[%c0_17, %c0_18], %19 {strides = array<i32>} : memref<16x256xf32, #tpu.memory_space<vmem>>, vector<16x128xf32>,
    %c0_19 = arith.constant 0 : index
    %c128 = arith.constant 128 : index
    %21 = vector.load %arg8[%c0_19, %c128] : memref<16x256xf32, #tpu.memory_space<vmem>>, vector<16x128xf32>
    tpu.vector_store %arg8[%c0_19, %c128], %14 {strides = array<i32>} : memref<16x256xf32, #tpu.memory_space<vmem>>, vector<16x128xf32>,
    return
  }
  func.func @transform_0(%arg0: i32) -> (i32, i32) {
    %c0_i32 = arith.constant 0 : i32
    %c0_i32_0 = arith.constant 0 : i32
    return %arg0, %c0_i32 : i32, i32
  }
  func.func @transform_1(%arg0: i32) -> (i32, i32) {
    %c0_i32 = arith.constant 0 : i32
    %c0_i32_0 = arith.constant 0 : i32
    %c0_i32_1 = arith.constant 0 : i32
    return %c0_i32, %c0_i32_0 : i32, i32
  }
  func.func @transform_2(%arg0: i32) -> (i32, i32) {
    %c0_i32 = arith.constant 0 : i32
    %c0_i32_0 = arith.constant 0 : i32
    %c0_i32_1 = arith.constant 0 : i32
    return %c0_i32, %c0_i32_0 : i32, i32
  }
  func.func @transform_3(%arg0: i32) -> (i32, i32) {
    %c0_i32 = arith.constant 0 : i32
    %c0_i32_0 = arith.constant 0 : i32
    %c0_i32_1 = arith.constant 0 : i32
    return %c0_i32, %c0_i32_0 : i32, i32
  }
  func.func @transform_4(%arg0: i32) -> (i32, i32) {
    %c0_i32 = arith.constant 0 : i32
    %c0_i32_0 = arith.constant 0 : i32
    %c0_i32_1 = arith.constant 0 : i32
    return %c0_i32, %c0_i32_0 : i32, i32
  }
  func.func @transform_5(%arg0: i32) -> (i32, i32) {
    %c0_i32 = arith.constant 0 : i32
    %c0_i32_0 = arith.constant 0 : i32
    %c0_i32_1 = arith.constant 0 : i32
    return %c0_i32, %c0_i32_0 : i32, i32
  }
  func.func @transform_6(%arg0: i32) -> (i32, i32) {
    %c0_i32 = arith.constant 0 : i32
    %c0_i32_0 = arith.constant 0 : i32
    %c0_i32_1 = arith.constant 0 : i32
    return %c0_i32, %c0_i32_0 : i32, i32
  }
  func.func @transform_7(%arg0: i32) -> (i32, i32) {
    %c0_i32 = arith.constant 0 : i32
    %c0_i32_0 = arith.constant 0 : i32
    return %arg0, %c0_i32 : i32, i32
  }
}

</mosaic_0001>

<bundles_post_ra>
// kernel: tpu_custom_call.1
= control target key start
LH: loop header
LB: loop body
LE: loop exit
PB: predicated region body
PF: predicated region fallthrough
CT: control target
= control target key end

     0   :  { %12 = vsyncpa [#allocation3], 0  ;;  %s1590_s0 = inlined_call_operand.hbm [shape: f32[32,32], index: 0, kind: input, shape index: {}]   ;;  %s1591_s1 = inlined_call_operand.hbm [shape: f32[32,128], index: 1, kind: input, shape index: {}]   ;;  %s1592_s2 = inlined_call_operand.vmem [shape: f32[1,128], index: 2, kind: input, shape index: {}]   ;;  %s1593_s3 = inlined_call_operand.hbm [shape: f32[128,128], index: 3, kind: input, shape index: {}]   ;;  %s1594_s4 = inlined_call_operand.vmem [shape: f32[1,128], index: 4, kind: input, shape index: {}]   ;;  %s1595_s5 = inlined_call_operand.hbm [shape: f32[128,128], index: 5, kind: input, shape index: {}]   ;;  %s1596_s6 = inlined_call_operand.vmem [shape: f32[1,128], index: 6, kind: input, shape index: {}]   ;;  %s1597_s7 = inlined_call_operand.hbm [shape: f32[32,256], index: 7, kind: output, shape index: {}]  }
   0x1   :  { %14 = vsyncpa [#allocation3 + $0x1], 0 }
   0x2   :  { %15 = vsyncpa [#allocation6], 0 }
   0x3   :  { %16 = vsyncpa [#allocation9], 0 }
   0x4   :  { %17 = vsyncpa [#allocation4], 0 }
   0x5   :  { %19 = vsyncpa [#allocation4 + $0x1], 0  ;;  %s1303_s24 = smov 0   ;;  %s1305_s25 = smov 0  }
   0x6   :  { %s1307_s26 = smov 0   ;;  %s1309_s27 = smov 0  }
   0x7 LB: > { %s1324_s28 = sadd.s32 4294967295, %s1252_s27   ;;  %s759_s29 = sadd.s32 4294967294, %s1252_s27   ;;  %s1252_s27 = sphi %s1309_s27, %s1623_s27   ;;  %s1248_s26 = sphi %s1307_s26, %s1622_s26   ;;  %s1244_s25 = sphi %s1305_s25, %s1621_s25   ;;  %s1240_s24 = sphi %s1303_s24, %s1620_s24  }
   0x8   : > { %p45_p0 = scmp.ne.s32.totalorder %s1244_s25, %s1240_s24  ;;  %p1598_p1 = scmp.eq.s32.totalorder %s1324_s28, 0 }
   0x9   : > { %p201_p3 = scmp.eq.s32.totalorder %s759_s29, 1  ;;  %p760_p5 = scmp.ge.s32.totalorder %s1252_s27, 1 }
   0xa   : > { %p1333_p4 = por %p1598_p1, %p45_p0  ;;  %p208_p7 = scmp.lt.s32.totalorder %s1252_s27, 3 }
   0xb   : > { %p1338_p6 = por %p201_p3, %p45_p0  ;;  %s1254_s10 = smov [#allocation5]  }
   0xc   : > { %s1602_s30 = scalar_select %p1333_p4, 1, 0 }
   0xd   : > { %s1603_s8 = scalar_select %p1338_p6, 1, 0 }
   0xe   : > { %p1343_p8 = pnand %p760_p5, %p208_p7  ;;  %s220_s11 = sshll.u32 %s1254_s10, 4  ;;  %s1347_s11 = int_to_ptr.vmem [resolvable:$true] %s220_s11 }
   0xf   : > { %1604 = sst [smem:[#allocation15_spill]] %s1603_s8  ;;  %s1255_s13 = smov [#allocation7]  }
  0x10   : > { %s1605_s9 = scalar_select %p1343_p8, 1, 0 }
  0x11   : > { %p999_p9 = pneg %p1343_p8  ;;  %s236_s14 = sshll.u32 %s1255_s13, 4  ;;  %s1358_s14 = int_to_ptr.vmem [resolvable:$true] %s236_s14 }
  0x12   : > { %s1256_s15 = smov [#allocation8]   ;;  %s1064_s19 = scalar_lea.hbm %s1591_s1, 512 }
  0x13   : > { %p1354_p11 = pnand %p999_p9, %p1598_p1  ;;  %s1360_s16 = sshll.u32 %s1256_s15, 4  ;;  %s253_s16 = int_to_ptr.vmem [resolvable:$true] %s1360_s16 }
  0x14   : > { %p1065_p12 = scmp.ne.s32.totalorder %s1591_s1, %s1064_s19  ;;  %p1071_p5 = scmp.lt.u32.totalorder %s1064_s19, %s1591_s1 }
  0x15   : > { %p1370_p13 = pneg %p1354_p11 }
  0x17   : > { %p1067_p0 = pnand %p1370_p13, %p1065_p12 }
  0x19   : > { %p1068_p3 = pneg %p1067_p0 }
  0x1b   : > { %p1073_p7 = pnand %p1071_p5, %p1068_p3 }
  0x1d   : > { %1076 = shalt.err (!%p1073_p7)
}
  0x1e   : > { %s1077_s10 = scalar_lea.vmem %s1347_s11, 512  ;;  %p1085_p2 = scmp.lt.s32.totalorder %s1347_s11, %s1347_s11 }
  0x1f   : > { %p1078_p9 = scmp.ne.s32.totalorder %s1347_s11, %s1077_s10  ;;  %p1086_p6 = scmp.lt.s32.totalorder %s1077_s10, %s1077_s10 }
  0x21   : > { %p1080_p10 = pnand %p1078_p9, %p1370_p13  ;;  %p1087_p12 = por %p1086_p6, %p1085_p2 }
  0x23   : > { %p1081_p1 = pneg %p1080_p10 }
  0x25   : > { %p1088_p0 = pnand %p1087_p12, %p1081_p1 }
  0x27   : > { %1091 = shalt.err (!%p1088_p0)
}
  0x28   : > { %s1257_s13 = smov 128   ;;  %s1258_s15 = smov 8  }
  0x29   : > { %1002 = dma.hbm_to_vmem [thread:$0]  (!%p1354_p11), %s1591_s1, 512, %s1347_s11, [#allocation6], %s1257_s13, %s1257_s13, %s1258_s15  }
  0x2a   : > { %s1092_s21 = scalar_lea.hbm %s1593_s3, 2048 }
  0x2b   : > { %p1093_p1 = scmp.ne.s32.totalorder %s1593_s3, %s1092_s21  ;;  %p1099_p10 = scmp.lt.u32.totalorder %s1092_s21, %s1593_s3 }
  0x2d   : > { %p1095_p2 = pnand %p1093_p1, %p1370_p13 }
  0x2f   : > { %p1096_p6 = pneg %p1095_p2 }
  0x31   : > { %p1101_p3 = pnand %p1099_p10, %p1096_p6 }
  0x33   : > { %1104 = shalt.err (!%p1101_p3)
}
  0x34   : > { %s1105_s11 = scalar_lea.vmem %s1358_s14, 2048  ;;  %p1113_p12 = scmp.lt.s32.totalorder %s1358_s14, %s1358_s14 }
  0x35   : > { %p1106_p5 = scmp.ne.s32.totalorder %s1358_s14, %s1105_s11  ;;  %p1114_p0 = scmp.lt.s32.totalorder %s1105_s11, %s1105_s11 }
  0x37   : > { %p1108_p7 = pnand %p1106_p5, %p1370_p13  ;;  %p1115_p1 = por %p1114_p0, %p1113_p12 }
  0x39   : > { %p1109_p9 = pneg %p1108_p7 }
  0x3b   : > { %p1116_p2 = pnand %p1115_p1, %p1109_p9 }
  0x3d   : > { %1119 = shalt.err (!%p1116_p2)
}
  0x3e   : > { %1005 = dma.hbm_to_vmem [thread:$0]  (!%p1354_p11), %s1593_s3, 2048, %s1358_s14, [#allocation6], %s1257_s13, %s1257_s13, %s1258_s15  }
  0x3f   : > { %s1120_s20 = scalar_lea.hbm %s1595_s5, 2048 }
  0x40   : > { %p1121_p6 = scmp.ne.s32.totalorder %s1595_s5, %s1120_s20  ;;  %p1127_p5 = scmp.lt.u32.totalorder %s1120_s20, %s1595_s5 }
  0x42   : > { %p1123_p10 = pnand %p1121_p6, %p1370_p13 }
  0x44   : > { %p1124_p3 = pneg %p1123_p10 }
  0x46   : > { %p1129_p7 = pnand %p1127_p5, %p1124_p3 }
  0x48   : > { %1132 = shalt.err (!%p1129_p7)
}
  0x49   : > { %s1133_s11 = scalar_lea.vmem %s253_s16, 2048  ;;  %p1141_p1 = scmp.lt.s32.totalorder %s253_s16, %s253_s16 }
  0x4a   : > { %p1134_p9 = scmp.ne.s32.totalorder %s253_s16, %s1133_s11  ;;  %p1142_p2 = scmp.lt.s32.totalorder %s1133_s11, %s1133_s11 }
  0x4c   : > { %p1136_p12 = pnand %p1134_p9, %p1370_p13  ;;  %p1143_p4 = por %p1142_p2, %p1141_p1 }
  0x4e   : > { %p1137_p0 = pneg %p1136_p12 }
  0x50   : > { %p1144_p8 = pnand %p1143_p4, %p1137_p0 }
  0x52   : > { %1147 = shalt.err (!%p1144_p8)
}
  0x53   : > { %1008 = dma.hbm_to_vmem [thread:$0]  (!%p1354_p11), %s1595_s5, 2048, %s253_s16, [#allocation9], %s1257_s13, %s1257_s13, %s1258_s15  }
  0x54   : > { %s1443_s22 = sadd.s32 1, %s1252_s27   ;;  %s32_s17 = sadd.s32 1, %s1248_s26 }
  0x55   : > { %s29_s12 = ssub.s32 %s1252_s27, %s1443_s22  ;;  %p39_p8 = scmp.ne.s32.totalorder %s1248_s26, %s1244_s25 }
  0x56   : > { %p30_p4 = scmp.eq.s32.totalorder %s29_s12, 0  ;;  %p40_p13 = scmp.eq.s32.totalorder %s1252_s27, 0 }
  0x57   : > { %p1020_p6 = scmp.lt.s32.totalorder %s1252_s27, 2  ;;  %p1608_p3 = scmp.eq.s32.totalorder %s1324_s28, 1 }
  0x58   : > { %s1453_s18 = scalar_select %p30_p4, %s1248_s26, %s32_s17  }
  0x59   : > { %p41_p10 = por %p40_p13, %p39_p8  ;;  %p1457_p5 = por %p1608_p3, %p39_p8 }
  0x5a   : > { %s269_s20 = sand.u32 1, %s1248_s26   ;;  %s785_s21 = sshll.u32 %s1252_s27, 8 }
  0x5b   : > { %s765_s16 = sshll.u32 %s269_s20, 4  ;;  %s1466_s10 = scalar_lea.hbm %s1590_s0, %s785_s21 }
  0x5c   : > { %s273_s11 = scalar_lea.vmem [#allocation2], %s765_s16  ;;  %p1468_p11 = pnand %p1020_p6, %p41_p10 }
  0x5d   : > { %s280_s14 = sshll.u32 %s273_s11, 4  ;;  %s1474_s12 = scalar_lea.sflag [#allocation3], %s269_s20  ;;  %s1472_s14 = int_to_ptr.vmem [resolvable:$true] %s280_s14 }
  0x5e   : > { %s1148_s17 = scalar_lea.hbm %s1466_s10, 256  ;;  %p1150_p9 = pneg %p1468_p11 }
  0x5f   : > { %p1149_p7 = scmp.ne.s32.totalorder %s1466_s10, %s1148_s17  ;;  %s1153_s23 = scalar_lea.hbm %s1590_s0, 512 }
  0x60   : > { %p1154_p1 = scmp.lt.u32.totalorder %s1466_s10, %s1590_s0  ;;  %p1155_p2 = scmp.lt.u32.totalorder %s1153_s23, %s1148_s17 }
  0x61   : > { %p1151_p12 = pnand %p1150_p9, %p1149_p7  ;;  %p1157_p8 = scmp.lt.u32.totalorder %s1148_s17, %s1466_s10 }
  0x62   : > { %p1156_p4 = por %p1155_p2, %p1154_p1 }
  0x63   : > { %p1152_p0 = pneg %p1151_p12 }
  0x64   : > { %p1158_p13 = por %p1157_p8, %p1156_p4 }
  0x66   : > { %p1159_p6 = pnand %p1158_p13, %p1152_p0 }
  0x68   : > { %1162 = shalt.err (!%p1159_p6)
}
  0x69   : > { %s1163_s20 = scalar_lea.vmem %s1472_s14, 256  ;;  %s1259_s21 = smov [#allocation2]  }
  0x6a   : > { %p1164_p10 = scmp.ne.s32.totalorder %s1472_s14, %s1163_s20  ;;  %s1168_s16 = sshll.u32 %s1259_s21, 4  ;;  %s1169_s16 = int_to_ptr.vmem [resolvable:$false] %s1168_s16 }
  0x6b   : > { %s1170_s29 = scalar_lea.vmem %s1169_s16, 512  ;;  %p1171_p12 = scmp.lt.s32.totalorder %s1472_s14, %s1169_s16 }
  0x6c   : > { %p1166_p3 = pnand %p1164_p10, %p1150_p9  ;;  %p1172_p1 = scmp.lt.s32.totalorder %s1170_s29, %s1163_s20 }
  0x6e   : > { %p1167_p7 = pneg %p1166_p3  ;;  %p1173_p2 = por %p1172_p1, %p1171_p12 }
  0x70   : > { %p1174_p4 = pnand %p1173_p2, %p1167_p7 }
  0x72   : > { %1177 = shalt.err (!%p1174_p4)
}
  0x73   : > { %1012 = dma.hbm_to_vmem [thread:$0]  (!%p1468_p11), %s1466_s10, 256, %s1472_s14, %s1474_s12, %s1257_s13, %s1257_s13, %s1258_s15  }
  0x74   : > { %p1611_p9 = scmp.ne.s32.totalorder %s1605_s9, 0 }
  0x75   : > { %s1508_s17 = sand.u32 (!%p1611_p9), 1, %s1244_s25   ;;  %p1612_p0 = scmp.ne.s32.totalorder (!%p1611_p9), %s1602_s30, 0 }
  0x76   : > { %292 = sbr.rel (%p1611_p9) target bundleno = 810 (0x32a), region = 48  ;;  %s769_s23 = sshll.u32 (!%p1611_p9), %s1508_s17, 4 }
  0x77   : > { %s295_s11 = scalar_lea.sflag (!%p1611_p9), [#allocation3], %s1508_s17  ;;  %s1512_s20 = scalar_lea.vmem (!%p1611_p9), [#allocation2], %s769_s23 }
  0x7d   : > { %1223 = dma.done.wait (%p1612_p0), %s295_s11, 256  }
  0x7e   : > { %1225 = vsyncadd (%p1612_p0), %s295_s11, 4294967040  ;;  %p1613_p11 = scmp.eq.s32.totalorder %s1324_s28, 0 }
  0x80   : > { %1227 = dma.done.wait (%p1613_p11), [#allocation6], 2560   ;;  %p1614_p8 = pmov %p1613_p11 }
  0x82   : > { %1229 = vsyncadd (%p1614_p8), [#allocation6], 4294964736  ;;  %p1615_p13 = pmov %p1614_p8 }
  0x83   : > { %p1616_p6 = pmov %p1614_p8 }
  0x84   : > { %1231 = dma.done.wait (%p1615_p13), [#allocation9], 2048  }
  0x85   : > { %1233 = vsyncadd (%p1616_p6), [#allocation9], 4294965248  ;;  %vm356_vm0 = vcmask 261120   ;;  %v345_v0 = vld [vmem:[#allocation5] sm:$0xff]  ;;  %v346_v1 = vld [vmem:[#allocation5 + $0x8] sm:$0xff]  ;;  %s773_s10 = sshll.u32 %s1508_s17, 5 }
  0x86   : > { %v347_v2 = vld [vmem:[#allocation5 + $0x10] sm:$0xff]  ;;  %v911_v3 = vpack.c.bf16 %v346_v1, %v345_v0  ;;  %v348_v4 = vld [vmem:[#allocation5 + $0x18] sm:$0xff]  ;;  %v440_v7 = vld [vmem:[#allocation7] sm:$0xff]  ;;  %s340_s14 = scalar_lea.vmem [#allocation10], %s773_s10  ;;  %s787_s16 = sshll.u32 %s1324_s28, 9 }
  0x87   : > { %v343_v5 = vld [vmem:[%s1512_s20] sm:$0xff]  ;;  %v915_v6 = vpack.c.bf16 %v348_v4, %v347_v2  ;;  %v441_v8 = vld [vmem:[#allocation7 + $0x8] sm:$0xff]  ;;  %v443_v11 = vld [vmem:[#allocation7 + $0x18] sm:$0xff]  ;;  %s657_s8 = sshll.u32 %s340_s14, 4  ;;  %s1546_s11 = scalar_lea.hbm %s1597_s7, %s787_s16  ;;  %s1541_s8 = int_to_ptr.vmem [resolvable:$true] %s657_s8 }
  0x88   : > { %838 = vmatprep.mubr.msk.f32.mxu0 %vm356_vm0, %v343_v5  ;;  %v442_v9 = vld [vmem:[#allocation7 + $0x10] sm:$0xff]  ;;  %912 = vmatprep.subr.bf16.mxu0 %v911_v3  ;;  %v919_v10 = vpack.c.bf16 %v441_v8, %v440_v7  ;;  %v444_v13 = vld [vmem:[#allocation7 + $0x20] sm:$0xff]  ;;  %v445_v14 = vld [vmem:[#allocation7 + $0x28] sm:$0xff]  ;;  %s1178_s30 = scalar_lea.vmem %s1541_s8, 512  ;;  %s1260_s28 = smov [#allocation10]  }
  0x89   : > { %914 = vmatpush3.bf16.msra.mxu0 %v911_v3  ;;  %v923_v12 = vpack.c.bf16 %v443_v11, %v442_v9  ;;  %v927_v15 = vpack.c.bf16 %v445_v14, %v444_v13  ;;  %v344_v16 = vld [vmem:[%s1512_s20 + $0x8] sm:$0xff]  ;;  %v446_v17 = vld [vmem:[#allocation7 + $0x30] sm:$0xff]  ;;  %v448_v20 = vld [vmem:[#allocation7 + $0x40] sm:$0xff]  ;;  %s643_s20 = scalar_lea.sflag [#allocation4], %s1508_s17  ;;  %p1179_p10 = scmp.ne.s32.totalorder %s1541_s8, %s1178_s30 }
  0x8a   : > { %916 = vmatprep.subr.bf16.mxu0 %v915_v6  ;;  %920 = vmatprep.subr.bf16.mxu1 %v919_v10  ;;  %v447_v18 = vld [vmem:[#allocation7 + $0x38] sm:$0xff]  ;;  %v449_v21 = vld [vmem:[#allocation7 + $0x48] sm:$0xff]  ;;  %v450_v23 = vld [vmem:[#allocation7 + $0x50] sm:$0xff]  ;;  %s1182_s9 = sshll.u32 %s1260_s28, 4  ;;  %s1183_s9 = int_to_ptr.vmem [resolvable:$false] %s1182_s9 }
  0x8b   : > { %922 = vmatpush3.bf16.msra.mxu1 %v919_v10  ;;  %v931_v19 = vpack.c.bf16 %v447_v18, %v446_v17  ;;  %v935_v22 = vpack.c.bf16 %v449_v21, %v448_v20  ;;  %v451_v24 = vld [vmem:[#allocation7 + $0x58] sm:$0xff]  ;;  %v452_v26 = vld [vmem:[#allocation7 + $0x60] sm:$0xff]  ;;  %v453_v27 = vld [vmem:[#allocation7 + $0x68] sm:$0xff]  ;;  %p1180_p3 = pnand %p1179_p10, %p1457_p5  ;;  %s1184_s13 = scalar_lea.vmem %s1183_s9, 1024 }
  0x8c   : > { %924 = vmatprep.subr.bf16.mxu1 %v923_v12  ;;  %v939_v25 = vpack.c.bf16 %v451_v24, %v450_v23  ;;  %v943_v28 = vpack.c.bf16 %v453_v27, %v452_v26  ;;  %v454_v29 = vld [vmem:[#allocation7 + $0x70] sm:$0xff]  ;;  %v455_v30 = vld [vmem:[#allocation7 + $0x78] sm:$0xff]  ;;  %v540_v32 = vld [vmem:[#allocation8] sm:$0xff]  ;;  %p1185_p12 = scmp.lt.s32.totalorder %s1541_s8, %s1183_s9  ;;  %p1186_p1 = scmp.lt.s32.totalorder %s1184_s13, %s1178_s30 }
  0x8d   : > { %918 = vmatpush3.bf16.msra.mxu0 %v915_v6  ;;  %v947_v31 = vpack.c.bf16 %v455_v30, %v454_v29  ;;  %v541_v33 = vld [vmem:[#allocation8 + $0x8] sm:$0xff]  ;;  %v542_v34 = vld [vmem:[#allocation8 + $0x10] sm:$0xff]  ;;  %v543_v36 = vld [vmem:[#allocation8 + $0x18] sm:$0xff]  ;;  %p1181_p7 = pneg %p1180_p3 }
  0x8e   : > { %v951_v35 = vpack.c.bf16 %v541_v33, %v540_v32  ;;  %v955_v37 = vpack.c.bf16 %v543_v36, %v542_v34  ;;  %v544_v38 = vld [vmem:[#allocation8 + $0x20] sm:$0xff]  ;;  %v545_v39 = vld [vmem:[#allocation8 + $0x28] sm:$0xff]  ;;  %v546_v41 = vld [vmem:[#allocation8 + $0x30] sm:$0xff]  ;;  %p1187_p2 = por %p1186_p1, %p1185_p12 }
  0x8f   : > { %926 = vmatpush3.bf16.msra.mxu1 %v923_v12  ;;  %v959_v40 = vpack.c.bf16 %v545_v39, %v544_v38  ;;  %v547_v42 = vld [vmem:[#allocation8 + $0x38] sm:$0xff]  ;;  %v548_v44 = vld [vmem:[#allocation8 + $0x40] sm:$0xff]  ;;  %v549_v45 = vld [vmem:[#allocation8 + $0x48] sm:$0xff] }
  0x90   : > { %839 = vmatmul.mubr.msk.f32.vlgmr.msra.gmra.mrb[0].mxu0 %vm356_vm0, %v344_v16  ;;  %928 = vmatprep.subr.bf16.mxu1 %v927_v15  ;;  %v963_v43 = vpack.c.bf16 %v547_v42, %v546_v41  ;;  %v967_v46 = vpack.c.bf16 %v549_v45, %v548_v44  ;;  %v550_v47 = vld [vmem:[#allocation8 + $0x50] sm:$0xff]  ;;  %v551_v48 = vld [vmem:[#allocation8 + $0x58] sm:$0xff]  ;;  %v552_v50 = vld [vmem:[#allocation8 + $0x60] sm:$0xff]  ;;  %p1188_p4 = pnand %p1187_p2, %p1181_p7 }
  0x91   : > { %952 = vmatprep.subr.bf16.mxu0 %v951_v35  ;;  %v971_v49 = vpack.c.bf16 %v551_v48, %v550_v47  ;;  %v553_v51 = vld [vmem:[#allocation8 + $0x68] sm:$0xff]  ;;  %v774_v53 = vld [vmem:[%s1592_s2] ss:$0 sm:$0xff]  ;;  %v554_v60 = vld [vmem:[#allocation8 + $0x70] sm:$0xff] }
  0x92   : > { %954 = vmatpush3.bf16.msra.mxu0 %v951_v35  ;;  %v975_v52 = vpack.c.bf16 %v553_v51, %v552_v50  ;;  %v555_v61 = vld [vmem:[#allocation8 + $0x78] sm:$0xff]  ;;  %v777_v63 = vld [vmem:[%s1594_s4] ss:$0 sm:$0xff] }
  0x93   : > { %930 = vmatpush3.bf16.msra.mxu1 %v927_v15  ;;  %956 = vmatprep.subr.bf16.mxu0 %v955_v37  ;;  %v979_v62 = vpack.c.bf16 %v555_v61, %v554_v60  ;;  %v778_v6 = vld [vmem:[%s1596_s6] ss:$0 sm:$0xff] }
  0x94   : > { %932 = vmatprep.subr.bf16.mxu1 %v931_v19 }
  0x96   : > { %958 = vmatpush3.bf16.msra.mxu0 %v955_v37 }
  0x97   : > { %934 = vmatpush3.bf16.msra.mxu1 %v931_v19  ;;  %960 = vmatprep.subr.bf16.mxu0 %v959_v40 }
  0x98   : > { %936 = vmatprep.subr.bf16.mxu1 %v935_v22 }
  0x9a   : > { %962 = vmatpush3.bf16.msra.mxu0 %v959_v40 }
  0x9b   : > { %938 = vmatpush3.bf16.msra.mxu1 %v935_v22  ;;  %964 = vmatprep.subr.bf16.mxu0 %v963_v43 }
  0x9c   : > { %940 = vmatprep.subr.bf16.mxu1 %v939_v25 }
  0x9e   : > { %966 = vmatpush3.bf16.msra.mxu0 %v963_v43 }
  0x9f   : > { %942 = vmatpush3.bf16.msra.mxu1 %v939_v25  ;;  %968 = vmatprep.subr.bf16.mxu0 %v967_v46 }
  0xa0   : > { %944 = vmatprep.subr.bf16.mxu1 %v943_v28 }
  0xa2   : > { %970 = vmatpush3.bf16.msra.mxu0 %v967_v46 }
  0xa3   : > { %946 = vmatpush3.bf16.msra.mxu1 %v943_v28  ;;  %972 = vmatprep.subr.bf16.mxu0 %v971_v49 }
  0xa4   : > { %948 = vmatprep.subr.bf16.mxu1 %v947_v31 }
  0xa6   : > { %974 = vmatpush3.bf16.msra.mxu0 %v971_v49 }
  0xa7   : > { %950 = vmatpush3.bf16.msra.mxu1 %v947_v31  ;;  %976 = vmatprep.subr.bf16.mxu0 %v975_v52 }
  0xaa   : > { %978 = vmatpush3.bf16.msra.mxu0 %v975_v52 }
  0xab   : > { %980 = vmatprep.subr.bf16.mxu0 %v979_v62 }
  0xae   : > { %982 = vmatpush3.bf16.msra.mxu0 %v979_v62 }
 0x163   : > { %v840_v54 = vpop.f32.mrb[0].mxu0 }
 0x164   : > { %v435_v55 = vadd.f32 %v840_v54, %v774_v53  ;;  %v429_v56 = vpop.f32.mrb[1].mxu0 }
 0x165   : > { %v430_v57 = vadd.f32 %v774_v53, %v429_v56 }
 0x166   : > { %v439_v59 = vmax.f32 %v435_v55, 0.0 }
 0x167   : > { %v438_v58 = vmax.f32 %v430_v57, 0.0 }
 0x169   : > { %873 = vmatprep.mubr.f32.mxu1 %v438_v58 }
 0x16a   : > { %874 = vmatmul.mubr.f32.vlgmr.msra.gmra.mrb[0].mxu1 %v439_v59 }
 0x23d   : > { %v875_v0 = vpop.f32.mrb[0].mxu1 }
 0x23e   : > { %v535_v1 = vadd.f32 %v875_v0, %v777_v63  ;;  %v529_v2 = vpop.f32.mrb[1].mxu1 }
 0x23f   : > { %v530_v3 = vadd.f32 %v777_v63, %v529_v2 }
 0x240   : > { %v539_v4 = vmax.f32 %v535_v1, 0.0 }
 0x241   : > { %v538_v5 = vmax.f32 %v530_v3, 0.0 }
 0x242   : > { %641 = vst [vmem:[%s340_s14 + $0x18] sm:$0xff] %v539_v4 }
 0x243   : > { %640 = vst [vmem:[%s340_s14 + $0x8] sm:$0xff] %v538_v5  ;;  %908 = vmatprep.mubr.f32.mxu0 %v538_v5 }
 0x244   : > { %909 = vmatmul.mubr.f32.vlgmr.msra.gmra.mrb[2].mxu0 %v539_v4 }
 0x317   : > { %v910_v7 = vpop.f32.mrb[2].mxu0 }
 0x318   : > { %v635_v8 = vadd.f32 %v910_v7, %v778_v6  ;;  %v629_v9 = vpop.f32.mrb[3].mxu0 }
 0x319   : > { %v630_v10 = vadd.f32 %v778_v6, %v629_v9 }
 0x31a   : > { %639 = vst [vmem:[%s340_s14 + $0x10] sm:$0xff] %v635_v8 }
 0x31b   : > { %638 = vst [vmem:[%s340_s14] sm:$0xff] %v630_v10 }
 0x31c   : > { %1191 = shalt.err (!%p1188_p4)
}
 0x31d   : > { %s1192_s15 = scalar_lea.hbm %s1546_s11, 512  ;;  %s1196_s12 = scalar_lea.hbm %s1597_s7, 1024 }
 0x31e   : > { %p1193_p9 = scmp.ne.s32.totalorder %s1546_s11, %s1192_s15  ;;  %p1197_p8 = scmp.lt.u32.totalorder %s1546_s11, %s1597_s7 }
 0x31f   : > { %p1198_p13 = scmp.lt.u32.totalorder %s1196_s12, %s1192_s15  ;;  %p1200_p10 = scmp.lt.u32.totalorder %s1192_s15, %s1546_s11 }
 0x320   : > { %p1194_p0 = pnand %p1193_p9, %p1457_p5 }
 0x321   : > { %p1199_p6 = por %p1198_p13, %p1197_p8 }
 0x322   : > { %p1195_p11 = pneg %p1194_p0 }
 0x323   : > { %p1201_p3 = por %p1200_p10, %p1199_p6 }
 0x325   : > { %p1202_p7 = pnand %p1201_p3, %p1195_p11 }
 0x327   : > { %1205 = shalt.err (!%p1202_p7)
}
 0x328   : > { %s1261_s29 = smov 256   ;;  %s1262_s23 = smov 16  }
 0x329   : > { %997 = dma.vmem_to_hbm [thread:$0]  (%p1457_p5), %s1541_s8, 512, %s1546_s11, %s643_s20, %s1261_s29, %s1261_s29, %s1262_s23  }
 0x32a PF: > { %s1617_s30 = sld [smem:[#allocation15_spill]]  ;;  %s672_s28 = sand.u32 1, %s1240_s24  }
 0x32b   : > { %p1619_p1 = scmp.ge.s32.totalorder %s1252_s27, 2  ;;  %s673_s9 = scalar_lea.sflag [#allocation4], %s672_s28 }
 0x330   : > { %p1618_p12 = scmp.ne.s32.totalorder %s1617_s30, 0 }
 0x332   : > { %p1014_p2 = pnand %p1619_p1, %p1618_p12 }
 0x334   : > { %1235 = dma.done.wait (!%p1014_p2), %s673_s9, 512  }
 0x335   : > { %1237 = vsyncadd (!%p1014_p2), %s673_s9, 4294966784  ;;  %p22_p4 = scmp.ge.s32.totalorder %s1443_s22, 4   ;;  %s1620_s24 = smov %s1244_s25 }
 0x336   : > { %s1621_s25 = smov %s1248_s26  ;;  %s1622_s26 = smov %s1453_s18 }
 0x337   : > { %s1623_s27 = smov %s1443_s22  ;;  %24 = sbr.rel (!%p22_p4) target bundleno = 7 (0x7), region = 105 }
 0x33e   :  { %678 = vsyncpa [#allocation3], 1 }
 0x33f   :  { %680 = vsyncpa [#allocation3 + $0x1], 1 }
 0x340   :  { %681 = vsyncpa [#allocation6], 1 }
 0x341   :  { %682 = vsyncpa [#allocation9], 1 }
 0x342   :  { %683 = vsyncpa [#allocation4], 1 }
 0x343   :  { %685 = vsyncpa [#allocation4 + $0x1], 1 }

</bundles_post_ra>
